<compile_context>
chip_gen: v5e
topology: v5e:2x2
jax: 0.10.0
libtpu: 0.0.40
codegen_flags: <defaults>
</compile_context>

<pallas_src>
import functools

import jax
import jax.numpy as jnp
from jax.experimental import pallas as pl
from jax.experimental.pallas import tpu as pltpu


def _rmsnorm_kernel(x_ref, w_ref, o_ref, *, eps):
    """One row-tile of tokens: o = (x_f32 * rsqrt(mean(x_f32^2) + eps)).astype * w."""
    x = x_ref[...].astype(jnp.float32)                      # (tm, dim) f32
    ms = jnp.mean(x * x, axis=-1, keepdims=True)            # (tm, 1)
    inv = jax.lax.rsqrt(ms + eps)                           # EUP rsqrt
    normed = (x * inv).astype(o_ref.dtype)                  # type_as(x)
    o_ref[...] = normed * w_ref[...].astype(o_ref.dtype)    # elementwise scale


def rms_norm(x, weight, *, eps=1e-6, row_tile=256):
    """x: [..., dim]; weight: [dim]. Returns same shape/dtype as x.

    row_tile: tokens per grid step. 256 is a good default for v6e/v7x; use 128
    on v5e. Sweep upward as long as 2 * 2 * row_tile * dim * itemsize fits the
    scoped VMEM budget.
    """
    orig_shape = x.shape
    dim = orig_shape[-1]
    M = 1
    for s in orig_shape[:-1]:
        M *= s

    x2d = x.reshape(M, dim)
    w2d = weight.reshape(1, dim)

    # Pad the token axis up to a multiple of the row tile (padded rows compute
    # rsqrt(eps) * 0 == 0, so they are harmless and sliced off afterwards).
    tm = row_tile
    m_pad = pl.cdiv(M, tm) * tm
    if m_pad != M:
        x2d = jnp.pad(x2d, ((0, m_pad - M), (0, 0)))

    grid = (m_pad // tm,)

    bytes_acc = (2 * m_pad * dim) * x.dtype.itemsize + dim * weight.dtype.itemsize
    cost = pl.CostEstimate(
        flops=4 * m_pad * dim,        # square, mean-accumulate, scale, weight mul
        transcendentals=m_pad,        # one rsqrt per token row
        bytes_accessed=bytes_acc,
    )

    out2d = pl.pallas_call(
        functools.partial(_rmsnorm_kernel, eps=eps),
        out_shape=jax.ShapeDtypeStruct((m_pad, dim), x.dtype),
        grid_spec=pltpu.PrefetchScalarGridSpec(
            num_scalar_prefetch=0,
            grid=grid,
            in_specs=[
                pl.BlockSpec((tm, dim), lambda i: (i, 0)),   # x row tile
                pl.BlockSpec((1, dim), lambda i: (0, 0)),    # weight (resident)
            ],
            out_specs=pl.BlockSpec((tm, dim), lambda i: (i, 0)),
        ),
        compiler_params=pltpu.CompilerParams(
            dimension_semantics=("parallel",),               # megacore split on v7x
        ),
        cost_estimate=cost,
    )(x2d, w2d)

    if m_pad != M:
        out2d = out2d[:M]
    return out2d.reshape(orig_shape)


def reference(x, weight, eps=1e-6):
    xf = x.astype(jnp.float32)
    normed = xf * jax.lax.rsqrt(jnp.mean(xf * xf, axis=-1, keepdims=True) + eps)
    return normed.astype(x.dtype) * weight


if __name__ == "__main__":
    # Small shapes consistent with the module: batch=2, seq=8, dim=32.
    batch, seq, dim = 2, 8, 32
    eps = 1e-6

    key = jax.random.PRNGKey(0)
    kx, kw = jax.random.split(key)

    x = jax.random.normal(kx, (batch, seq, dim), jnp.float32)

    # 1) Module default init: weight = ones.
    w_ones = jnp.ones((dim,), jnp.float32)
    out1 = jax.block_until_ready(rms_norm(x, w_ones, eps=eps))
    ref1 = reference(x, w_ones, eps=eps)
    assert out1.shape == x.shape
    assert jnp.allclose(out1, ref1, atol=1e-5, rtol=1e-5), "mismatch (weight=ones)"

    # 2) Non-trivial weight to exercise the scale path.
    w_rand = 1.0 + 0.1 * jax.random.normal(kw, (dim,), jnp.float32)
    out2 = jax.block_until_ready(rms_norm(x, w_rand, eps=eps))
    ref2 = reference(x, w_rand, eps=eps)
    assert jnp.allclose(out2, ref2, atol=1e-5, rtol=1e-5), "mismatch (weight=rand)"

    print("KERNEL_OK")
</pallas_src>

<mosaic_0001>
module attributes {stable_mosaic.version = 11 : i64} {
  func.func @_rmsnorm_kernel(%arg0: i32, %arg1: memref<256x32xf32, #tpu.memory_space<vmem>>, %arg2: memref<1x32xf32, #tpu.memory_space<vmem>>, %arg3: memref<256x32xf32, #tpu.memory_space<vmem>>) attributes {dimension_semantics = [#tpu.dimension_semantics<parallel>], iteration_bounds = array<i64: 1>, scalar_prefetch = 0 : i64, scratch_operands = 0 : i64, tpu.core_type = #tpu.core_type<tc>, window_params = [{transform_indices = @transform_0, window_bounds = array<i64: 256, 32>}, {pipeline_mode = #tpu.pipeline_mode<synchronous>, transform_indices = @transform_1, window_bounds = array<i64: 1, 32>}, {transform_indices = @transform_2, window_bounds = array<i64: 256, 32>}]} {
    %c0 = arith.constant 0 : index
    %c0_0 = arith.constant 0 : index
    %0 = vector.load %arg1[%c0, %c0_0] : memref<256x32xf32, #tpu.memory_space<vmem>>, vector<256x32xf32>
    %1 = arith.mulf %0, %0 : vector<256x32xf32>
    %cst = arith.constant dense<0.000000e+00> : vector<256xf32>
    %2 = vector.multi_reduction <add>, %1, %cst [1] : vector<256x32xf32> to vector<256xf32>
    %3 = vector.shape_cast %2 : vector<256xf32> to vector<256x1xf32>
    %cst_1 = arith.constant 3.200000e+01 : f32
    %4 = vector.broadcast %cst_1 : f32 to vector<256x1xf32>
    %5 = arith.divf %3, %4 : vector<256x1xf32>
    %cst_2 = arith.constant 9.99999997E-7 : f32
    %6 = vector.broadcast %cst_2 : f32 to vector<256x1xf32>
    %7 = arith.addf %5, %6 : vector<256x1xf32>
    %8 = math.rsqrt %7 : vector<256x1xf32>
    %9 = vector.broadcast %8 : vector<256x1xf32> to vector<256x32xf32>
    %10 = arith.mulf %0, %9 : vector<256x32xf32>
    %c0_3 = arith.constant 0 : index
    %c0_4 = arith.constant 0 : index
    %11 = vector.load %arg2[%c0_3, %c0_4] : memref<1x32xf32, #tpu.memory_space<vmem>>, vector<1x32xf32>
    %12 = vector.broadcast %11 : vector<1x32xf32> to vector<256x32xf32>
    %13 = arith.mulf %10, %12 : vector<256x32xf32>
    %c0_5 = arith.constant 0 : index
    %c0_6 = arith.constant 0 : index
    %14 = vector.load %arg3[%c0_5, %c0_6] : memref<256x32xf32, #tpu.memory_space<vmem>>, vector<256x32xf32>
    tpu.vector_store %arg3[%c0_5, %c0_6], %13 {strides = array<i32>} : memref<256x32xf32, #tpu.memory_space<vmem>>, vector<256x32xf32>,
    return
  }
  func.func @transform_0(%arg0: i32) -> (i32, i32) {
    %c0_i32 = arith.constant 0 : i32
    %c0_i32_0 = arith.constant 0 : i32
    return %arg0, %c0_i32 : i32, i32
  }
  func.func @transform_1(%arg0: i32) -> (i32, i32) {
    %c0_i32 = arith.constant 0 : i32
    %c0_i32_0 = arith.constant 0 : i32
    %c0_i32_1 = arith.constant 0 : i32
    return %c0_i32, %c0_i32_0 : i32, i32
  }
  func.func @transform_2(%arg0: i32) -> (i32, i32) {
    %c0_i32 = arith.constant 0 : i32
    %c0_i32_0 = arith.constant 0 : i32
    return %arg0, %c0_i32 : i32, i32
  }
}

</mosaic_0001>

<bundles_post_ra>
// kernel: tpu_custom_call.1
= control target key start
LH: loop header
LB: loop body
LE: loop exit
PB: predicated region body
PF: predicated region fallthrough
CT: control target
= control target key end

     0   :  { %vm75_vm0 = vcmask 261120   ;;  %s1605_s0 = inlined_call_operand.vmem [shape: f32[256,32], index: 0, kind: input, shape index: {}]   ;;  %s1606_s1 = inlined_call_operand.vmem [shape: f32[1,32], index: 1, kind: input, shape index: {}]   ;;  %s1607_s2 = inlined_call_operand.vmem [shape: f32[256,32], index: 2, kind: output, shape index: {}]  }
   0x1   :  { %v762_v0 = vld [vmem:[%s1605_s0 + $0x20] sm:$0xff]  ;;  %v767_v1 = vld [vmem:[%s1605_s0 + $0x10] sm:$0xff]  ;;  %v783_v6 = vld [vmem:[%s1605_s0 + $0x28] sm:$0xff] }
   0x2   :  { %v772_v2 = vld [vmem:[%s1605_s0] sm:$0xff]  ;;  %v47_v3 = vmul.f32 %v762_v0, %v762_v0  ;;  %v45_v4 = vmul.f32 %v767_v1, %v767_v1  ;;  %v788_v7 = vld [vmem:[%s1605_s0 + $0x18] sm:$0xff]  ;;  %v796_v11 = vld [vmem:[%s1605_s0 + $0x8] sm:$0xff]  ;;  %v48_v12 = vmul.f32 %v783_v6, %v783_v6 }
   0x3   :  { %v43_v5 = vmul.f32 %v772_v2, %v772_v2  ;;  %v46_v13 = vmul.f32 %v788_v7, %v788_v7  ;;  %v44_v14 = vmul.f32 %v796_v11, %v796_v11  ;;  %v810_v18 = vld [vmem:[%s1605_s0 + $0x40] sm:$0xff]  ;;  %v815_v19 = vld [vmem:[%s1605_s0 + $0x38] sm:$0xff]  ;;  %v820_v20 = vld [vmem:[%s1605_s0 + $0x30] sm:$0xff] }
   0x4   :  { %v88_v8 = vsel %vm75_vm0, %v47_v3, 0.0  ;;  %v82_v9 = vsel %vm75_vm0, %v45_v4, 0.0  ;;  %v91_v15 = vsel %vm75_vm0, %v48_v12, 0.0  ;;  %v51_v21 = vmul.f32 %v810_v18, %v810_v18  ;;  %v834_v27 = vld [vmem:[%s1605_s0 + $0x58] sm:$0xff]  ;;  %v839_v28 = vld [vmem:[%s1605_s0 + $0x50] sm:$0xff]  ;;  %v844_v29 = vld [vmem:[%s1605_s0 + $0x48] sm:$0xff] }
   0x5   :  { %v76_v10 = vsel %vm75_vm0, %v43_v5, 0.0  ;;  %89 = vadd.xlane.f32.xlu2 %v88_v8  ;;  %83 = vadd.xlane.f32.xlu1 %v82_v9  ;;  %v85_v16 = vsel %vm75_vm0, %v46_v13, 0.0  ;;  %v79_v17 = vsel %vm75_vm0, %v44_v14, 0.0  ;;  %v50_v22 = vmul.f32 %v815_v19, %v815_v19  ;;  %v858_v36 = vld [vmem:[%s1605_s0 + $0x70] sm:$0xff]  ;;  %v863_v37 = vld [vmem:[%s1605_s0 + $0x68] sm:$0xff]  ;;  %v868_v38 = vld [vmem:[%s1605_s0 + $0x60] sm:$0xff] }
   0x6   :  { %77 = vadd.xlane.f32.xlu0 %v76_v10  ;;  %v49_v23 = vmul.f32 %v820_v20, %v820_v20  ;;  %v100_v24 = vsel %vm75_vm0, %v51_v21, 0.0  ;;  %v54_v30 = vmul.f32 %v834_v27, %v834_v27  ;;  %v53_v31 = vmul.f32 %v839_v28, %v839_v28  ;;  %v882_v45 = vld [vmem:[%s1605_s0 + $0x88] sm:$0xff]  ;;  %v887_v46 = vld [vmem:[%s1605_s0 + $0x80] sm:$0xff]  ;;  %v892_v47 = vld [vmem:[%s1605_s0 + $0x78] sm:$0xff] }
   0x7   :  { %v97_v25 = vsel %vm75_vm0, %v50_v22, 0.0  ;;  %v52_v32 = vmul.f32 %v844_v29, %v844_v29  ;;  %v57_v39 = vmul.f32 %v858_v36, %v858_v36  ;;  %v56_v40 = vmul.f32 %v863_v37, %v863_v37  ;;  %v906_v54 = vld [vmem:[%s1605_s0 + $0xa0] sm:$0xff]  ;;  %v911_v55 = vld [vmem:[%s1605_s0 + $0x98] sm:$0xff]  ;;  %v916_v56 = vld [vmem:[%s1605_s0 + $0x90] sm:$0xff] }
   0x8   :  { %v94_v26 = vsel %vm75_vm0, %v49_v23, 0.0  ;;  %v109_v33 = vsel %vm75_vm0, %v54_v30, 0.0  ;;  %v106_v34 = vsel %vm75_vm0, %v53_v31, 0.0  ;;  %v55_v41 = vmul.f32 %v868_v38, %v868_v38  ;;  %v930_v63 = vld [vmem:[%s1605_s0 + $0xb8] sm:$0xff]  ;;  %v935_v3 = vld [vmem:[%s1605_s0 + $0xb0] sm:$0xff]  ;;  %v940_v4 = vld [vmem:[%s1605_s0 + $0xa8] sm:$0xff] }
   0x9   :  { %v103_v35 = vsel %vm75_vm0, %v52_v32, 0.0  ;;  %v118_v42 = vsel %vm75_vm0, %v57_v39, 0.0  ;;  %v115_v43 = vsel %vm75_vm0, %v56_v40, 0.0  ;;  %v60_v48 = vmul.f32 %v882_v45, %v882_v45  ;;  %v37_v14 = vld [vmem:[%s1605_s0 + $0xd0] sm:$0xff]  ;;  %v39_v30 = vld [vmem:[%s1605_s0 + $0xe0] sm:$0xff]  ;;  %v38_v31 = vld [vmem:[%s1605_s0 + $0xd8] sm:$0xff] }
   0xa   :  { %v112_v44 = vsel %vm75_vm0, %v55_v41, 0.0  ;;  %v59_v49 = vmul.f32 %v887_v46, %v887_v46  ;;  %v58_v50 = vmul.f32 %v892_v47, %v892_v47  ;;  %v63_v57 = vmul.f32 %v906_v54, %v906_v54  ;;  %v42_v41 = vld [vmem:[%s1605_s0 + $0xf8] sm:$0xff] }
   0xb   :  { %v127_v51 = vsel %vm75_vm0, %v60_v48, 0.0  ;;  %v62_v58 = vmul.f32 %v911_v55, %v911_v55  ;;  %v61_v59 = vmul.f32 %v916_v56, %v916_v56  ;;  %v66_v5 = vmul.f32 %v930_v63, %v930_v63 }
   0xc   :  { %v124_v52 = vsel %vm75_vm0, %v59_v49, 0.0  ;;  %v121_v53 = vsel %vm75_vm0, %v58_v50, 0.0  ;;  %v136_v60 = vsel %vm75_vm0, %v63_v57, 0.0  ;;  %v65_v8 = vmul.f32 %v935_v3, %v935_v3 }
   0xd   :  { %92 = vadd.xlane.f32.xlu2 %v91_v15  ;;  %86 = vadd.xlane.f32.xlu1 %v85_v16  ;;  %v133_v61 = vsel %vm75_vm0, %v62_v58, 0.0  ;;  %v130_v62 = vsel %vm75_vm0, %v61_v59, 0.0  ;;  %v64_v9 = vmul.f32 %v940_v4, %v940_v4  ;;  %v145_v10 = vsel %vm75_vm0, %v66_v5, 0.0  ;;  %v36_v15 = vld [vmem:[%s1605_s0 + $0xc8] sm:$0xff]  ;;  %v35_v16 = vld [vmem:[%s1605_s0 + $0xc0] sm:$0xff] }
   0xe   :  { %80 = vadd.xlane.f32.xlu0 %v79_v17  ;;  %v142_v12 = vsel %vm75_vm0, %v65_v8, 0.0  ;;  %v69_v17 = vmul.f32 %v37_v14, %v37_v14  ;;  %v68_v21 = vmul.f32 %v36_v15, %v36_v15  ;;  %v67_v22 = vmul.f32 %v35_v16, %v35_v16 }
   0xf   :  { %v139_v13 = vsel %vm75_vm0, %v64_v9, 0.0  ;;  %v743_v50 = vmov 32.0  }
  0x10   :  { %v154_v23 = vsel %vm75_vm0, %v69_v17, 0.0  ;;  %669 = vrcp.f32 %v743_v50 }
  0x15   :  { %101 = vadd.xlane.f32.xlu2 %v100_v24  ;;  %98 = vadd.xlane.f32.xlu1 %v97_v25  ;;  %v151_v24 = vsel %vm75_vm0, %v68_v21, 0.0  ;;  %v148_v25 = vsel %vm75_vm0, %v67_v22, 0.0 }
  0x16   :  { %95 = vadd.xlane.f32.xlu0 %v94_v26  ;;  %v40_v26 = vld [vmem:[%s1605_s0 + $0xe8] sm:$0xff] }
  0x17   :  { %v72_v32 = vmul.f32 %v40_v26, %v40_v26 }
  0x1d   :  { %110 = vadd.xlane.f32.xlu2 %v109_v33  ;;  %107 = vadd.xlane.f32.xlu1 %v106_v34  ;;  %v71_v33 = vmul.f32 %v39_v30, %v39_v30  ;;  %v70_v34 = vmul.f32 %v38_v31, %v38_v31 }
  0x1e   :  { %104 = vadd.xlane.f32.xlu0 %v103_v35  ;;  %v163_v35 = vsel %vm75_vm0, %v72_v32, 0.0 }
  0x1f   :  { %v160_v39 = vsel %vm75_vm0, %v71_v33, 0.0  ;;  %v157_v40 = vsel %vm75_vm0, %v70_v34, 0.0 }
  0x25   :  { %119 = vadd.xlane.f32.xlu2 %v118_v42  ;;  %116 = vadd.xlane.f32.xlu1 %v115_v43  ;;  %v41_v42 = vld [vmem:[%s1605_s0 + $0xf0] sm:$0xff]  ;;  %v74_v43 = vmul.f32 %v42_v41, %v42_v41 }
  0x26   :  { %113 = vadd.xlane.f32.xlu0 %v112_v44  ;;  %v73_v44 = vmul.f32 %v41_v42, %v41_v42 }
  0x27   :  { %v169_v48 = vsel %vm75_vm0, %v74_v43, 0.0 }
  0x28   :  { %v166_v49 = vsel %vm75_vm0, %v73_v44, 0.0 }
  0x2d   :  { %128 = vadd.xlane.f32.xlu2 %v127_v51  ;;  %125 = vadd.xlane.f32.xlu1 %v124_v52  ;;  %v670_v51 = vpop.eup %669 }
  0x2e   :  { %122 = vadd.xlane.f32.xlu0 %v121_v53  ;;  %v173_v52 = vmul.f32 32.0, %v670_v51  ;;  %vm177_vm1 = vweird.f32 %v670_v51 }
  0x30   :  { %v174_v53 = vsub.f32 1.0, %v173_v52 }
  0x32   :  { %v175_v57 = vmul.f32 %v670_v51, %v174_v53 }
  0x34   :  { %v176_v58 = vadd.f32 %v670_v51, %v175_v57 }
  0x35   :  { %137 = vadd.xlane.f32.xlu2 %v136_v60  ;;  %134 = vadd.xlane.f32.xlu1 %v133_v61 }
  0x36   :  { %131 = vadd.xlane.f32.xlu0 %v130_v62  ;;  %v983_v59 = vsel %vm177_vm1, %v670_v51, %v176_v58 }
  0x3d   :  { %146 = vadd.xlane.f32.xlu2 %v145_v10  ;;  %143 = vadd.xlane.f32.xlu1 %v142_v12 }
  0x3e   :  { %140 = vadd.xlane.f32.xlu0 %v139_v13 }
  0x45   :  { %155 = vadd.xlane.f32.xlu2 %v154_v23  ;;  %152 = vadd.xlane.f32.xlu1 %v151_v24 }
  0x46   :  { %149 = vadd.xlane.f32.xlu0 %v148_v25 }
  0x4d   :  { %164 = vadd.xlane.f32.xlu2 %v163_v35  ;;  %161 = vadd.xlane.f32.xlu1 %v160_v39 }
  0x4e   :  { %158 = vadd.xlane.f32.xlu0 %v157_v40 }
  0x55   :  { %170 = vadd.xlane.f32.xlu1 %v169_v48 }
  0x56   :  { %167 = vadd.xlane.f32.xlu0 %v166_v49 }
  0x78   :  { %v90_v60 = vpop.xlane.xlu2 %89  ;;  %v84_v61 = vpop.xlane.xlu1 %83 }
  0x79   :  { %v183_v62 = vmul.f32 %v983_v59, %v90_v60  ;;  %v181_v5 = vmul.f32 %v983_v59, %v84_v61  ;;  %v78_v8 = vpop.xlane.xlu0 %77 }
  0x7a   :  { %v179_v9 = vmul.f32 %v983_v59, %v78_v8 }
  0x7b   :  { %v215_v10 = vadd.f32 1e-06, %v183_v62  ;;  %v213_v12 = vadd.f32 1e-06, %v181_v5 }
  0x7c   :  { %v988_v13 = vadd.f32 1e-06, %v179_v9  ;;  %v1021_v9 = vld [vmem:[%s1606_s1] ss:$0 sm:$0xff] }
  0x7d   :  { %671 = vrsqrt.f32 %v215_v10  ;;  %vm289_vm2 = vweird.f32 %v215_v10  ;;  %vm269_vm3 = vweird.f32 %v213_v12 }
  0x7e   :  { %673 = vrsqrt.f32 %v213_v12  ;;  %vm249_vm5 = vweird.f32 %v988_v13 }
  0x7f   :  { %675 = vrsqrt.f32 %v988_v13 }
  0x80   :  { %v93_v14 = vpop.xlane.xlu2 %92  ;;  %v87_v15 = vpop.xlane.xlu1 %86 }
  0x81   :  { %v184_v16 = vmul.f32 %v983_v59, %v93_v14  ;;  %v182_v17 = vmul.f32 %v983_v59, %v87_v15  ;;  %v81_v21 = vpop.xlane.xlu0 %80 }
  0x82   :  { %v180_v22 = vmul.f32 %v983_v59, %v81_v21 }
  0x83   :  { %v672_v23 = vpop.eup %671  ;;  %v994_v24 = vadd.f32 1e-06, %v184_v16  ;;  %v996_v25 = vadd.f32 1e-06, %v182_v17 }
  0x84   :  { %v674_v26 = vpop.eup %673  ;;  %v284_v30 = vmul.f32 %v672_v23, %v215_v10  ;;  %v998_v31 = vadd.f32 1e-06, %v180_v22  ;;  %vm290_vm4 = vweird.f32 %v672_v23 }
  0x85   :  { %v676_v32 = vpop.eup %675  ;;  %v264_v33 = vmul.f32 %v674_v26, %v213_v12  ;;  %677 = vrsqrt.f32 %v994_v24  ;;  %vm270_vm6 = vweird.f32 %v674_v26  ;;  %vm299_vm7 = vweird.f32 %v994_v24  ;;  %vm291_vm9 = vmor %vm289_vm2, %vm290_vm4 }
  0x86   :  { %v285_v34 = vmul.f32 %v672_v23, %v284_v30  ;;  %v244_v35 = vmul.f32 %v676_v32, %v988_v13  ;;  %679 = vrsqrt.f32 %v996_v25  ;;  %vm250_vm8 = vweird.f32 %v676_v32  ;;  %vm271_vm11 = vmor %vm269_vm3, %vm270_vm6 }
  0x87   :  { %v265_v39 = vmul.f32 %v674_v26, %v264_v33  ;;  %681 = vrsqrt.f32 %v998_v31  ;;  %vm279_vm10 = vweird.f32 %v996_v25  ;;  %vm251_vm12 = vmor %vm249_vm5, %vm250_vm8  ;;  %vm259_vm2 = vweird.f32 %v998_v31 }
  0x88   :  { %v286_v40 = vmul.f32 0.5, %v285_v34  ;;  %v245_v41 = vmul.f32 %v676_v32, %v244_v35  ;;  %v102_v42 = vpop.xlane.xlu2 %101  ;;  %v99_v43 = vpop.xlane.xlu1 %98 }
  0x89   :  { %v266_v44 = vmul.f32 0.5, %v265_v39  ;;  %v187_v48 = vmul.f32 %v983_v59, %v102_v42  ;;  %v186_v49 = vmul.f32 %v983_v59, %v99_v43  ;;  %v96_v50 = vpop.xlane.xlu0 %95 }
  0x8a   :  { %v287_v51 = vsub.f32 1.5, %v286_v40  ;;  %v246_v52 = vmul.f32 0.5, %v245_v41 }
  0x8b   :  { %v1007_v53 = vpop.eup %677  ;;  %v267_v57 = vsub.f32 1.5, %v266_v44  ;;  %v1010_v58 = vadd.f32 1e-06, %v187_v48  ;;  %v1029_v16 = vadd.f32 1e-06, %v186_v49 }
  0x8c   :  { %v1012_v60 = vpop.eup %679  ;;  %v288_v61 = vmul.f32 %v672_v23, %v287_v51  ;;  %v247_v62 = vsub.f32 1.5, %v246_v52  ;;  %v294_v5 = vmul.f32 %v1007_v53, %v994_v24  ;;  %vm300_vm13 = vweird.f32 %v1007_v53 }
  0x8d   :  { %v1016_v8 = vpop.eup %681  ;;  %v268_v14 = vmul.f32 %v674_v26, %v267_v57  ;;  %v274_v15 = vmul.f32 %v1012_v60, %v996_v25  ;;  %683 = vrsqrt.f32 %v1010_v58  ;;  %vm280_vm14 = vweird.f32 %v1012_v60  ;;  %vm301_vm1 = vmor %vm299_vm7, %vm300_vm13 }
  0x8e   :  { %v292_v17 = vsel %vm291_vm9, %v672_v23, %v288_v61  ;;  %v248_v21 = vmul.f32 %v676_v32, %v247_v62  ;;  %v295_v22 = vmul.f32 %v1007_v53, %v294_v5  ;;  %v254_v10 = vmul.f32 %v1016_v8, %v998_v31  ;;  %vm281_vm3 = vmor %vm279_vm10, %vm280_vm14 }
  0x8f   :  { %v567_v30 = vmul.f32 %v292_v17, %v762_v0  ;;  %v272_v33 = vsel %vm271_vm11, %v674_v26, %v268_v14  ;;  %v275_v34 = vmul.f32 %v1012_v60, %v274_v15  ;;  %v185_v23 = vmul.f32 %v983_v59, %v96_v50 }
  0x90   :  { %v565_v12 = vmul.f32 %v272_v33, %v767_v1  ;;  %v252_v35 = vsel %vm251_vm12, %v676_v32, %v248_v21  ;;  %v296_v39 = vmul.f32 0.5, %v295_v22  ;;  %v255_v40 = vmul.f32 %v1016_v8, %v254_v10  ;;  %v111_v41 = vpop.xlane.xlu2 %110  ;;  %v108_v42 = vpop.xlane.xlu1 %107 }
  0x91   :  { %v603_v43 = vmul.f32 %v1021_v9, %v567_v30  ;;  %v563_v0 = vmul.f32 %v252_v35, %v772_v2  ;;  %v276_v13 = vmul.f32 0.5, %v275_v34  ;;  %v105_v26 = vpop.xlane.xlu0 %104  ;;  %685 = vrsqrt.f32 %v1029_v16 }
  0x92   :  { %v601_v44 = vmul.f32 %v1021_v9, %v565_v12  ;;  %v297_v48 = vsub.f32 1.5, %v296_v39  ;;  %v256_v49 = vmul.f32 0.5, %v255_v40  ;;  %v1057_v50 = vadd.f32 1e-06, %v185_v23 }
  0x93   :  { %v1049_v1 = vpop.eup %683  ;;  %635 = vst.msk [vmem:[%s1607_s2 + $0x20] sm:$0xff] %vm75_vm0, %v603_v43  ;;  %v599_v32 = vmul.f32 %v1021_v9, %v563_v0  ;;  %v277_v2 = vsub.f32 1.5, %v276_v13  ;;  %vm260_vm15 = vweird.f32 %v1016_v8  ;;  %v190_v62 = vmul.f32 %v983_v59, %v111_v41 }
  0x94   :  { %633 = vst.msk [vmem:[%s1607_s2 + $0x10] sm:$0xff] %vm75_vm0, %v601_v44  ;;  %v298_v51 = vmul.f32 %v1007_v53, %v297_v48  ;;  %v257_v52 = vsub.f32 1.5, %v256_v49  ;;  %v324_v57 = vmul.f32 %v1049_v1, %v1010_v58  ;;  %687 = vrsqrt.f32 %v1057_v50  ;;  %vm261_vm4 = vmor %vm259_vm2, %vm260_vm15 }
  0x95   :  { %631 = vst.msk [vmem:[%s1607_s2] sm:$0xff] %vm75_vm0, %v599_v32  ;;  %v278_v61 = vmul.f32 %v1012_v60, %v277_v2  ;;  %v189_v24 = vmul.f32 %v983_v59, %v108_v42  ;;  %v1089_v31 = vadd.f32 1e-06, %v190_v62  ;;  %vm329_vm5 = vweird.f32 %v1010_v58 }
  0x96   :  { %v302_v5 = vsel %vm301_vm1, %v1007_v53, %v298_v51  ;;  %v258_v14 = vmul.f32 %v1016_v8, %v257_v52  ;;  %v325_v15 = vmul.f32 %v1049_v1, %v324_v57  ;;  %v188_v53 = vmul.f32 %v983_v59, %v105_v26 }
  0x97   :  { %v568_v17 = vmul.f32 %v302_v5, %v783_v6  ;;  %v282_v21 = vsel %vm281_vm3, %v1012_v60, %v278_v61  ;;  %v1092_v22 = vpop.eup %685  ;;  %v1096_v33 = vadd.f32 1e-06, %v189_v24  ;;  %vm330_vm6 = vweird.f32 %v1049_v1 }
  0x98   :  { %v566_v25 = vmul.f32 %v282_v21, %v788_v7  ;;  %v262_v10 = vsel %vm261_vm4, %v1016_v8, %v258_v14  ;;  %v326_v30 = vmul.f32 0.5, %v325_v15  ;;  %v120_v34 = vpop.xlane.xlu2 %119  ;;  %v117_v6 = vpop.xlane.xlu1 %116  ;;  %v314_v12 = vmul.f32 %v1092_v22, %v1029_v16  ;;  %vm331_vm7 = vmor %vm329_vm5, %vm330_vm6 }
  0x99   :  { %v604_v60 = vmul.f32 %v1021_v9, %v568_v17  ;;  %v564_v23 = vmul.f32 %v262_v10, %v796_v11  ;;  %v114_v35 = vpop.xlane.xlu0 %113  ;;  %689 = vrsqrt.f32 %v1089_v31  ;;  %v1119_v43 = vadd.f32 1e-06, %v188_v53 }
  0x9a   :  { %v602_v39 = vmul.f32 %v1021_v9, %v566_v25  ;;  %v327_v7 = vsub.f32 1.5, %v326_v30  ;;  %v688_v8 = vpop.eup %687  ;;  %v315_v40 = vmul.f32 %v1092_v22, %v314_v12  ;;  %691 = vrsqrt.f32 %v1096_v33 }
  0x9b   :  { %636 = vst.msk [vmem:[%s1607_s2 + $0x28] sm:$0xff] %vm75_vm0, %v604_v60  ;;  %v600_v11 = vmul.f32 %v1021_v9, %v564_v23  ;;  %v304_v42 = vmul.f32 %v688_v8, %v1057_v50  ;;  %v193_v13 = vmul.f32 %v983_v59, %v120_v34  ;;  %v192_v26 = vmul.f32 %v983_v59, %v117_v6 }
  0x9c   :  { %634 = vst.msk [vmem:[%s1607_s2 + $0x18] sm:$0xff] %vm75_vm0, %v602_v39  ;;  %v328_v41 = vmul.f32 %v1049_v1, %v327_v7  ;;  %v316_v0 = vmul.f32 0.5, %v315_v40  ;;  %v191_v44 = vmul.f32 %v983_v59, %v114_v35  ;;  %vm320_vm8 = vweird.f32 %v1092_v22 }
  0x9d   :  { %632 = vst.msk [vmem:[%s1607_s2 + $0x8] sm:$0xff] %vm75_vm0, %v600_v11  ;;  %v305_v49 = vmul.f32 %v688_v8, %v304_v42  ;;  %693 = vrsqrt.f32 %v1119_v43  ;;  %v1134_v51 = vadd.f32 1e-06, %v193_v13  ;;  %v1136_v58 = vadd.f32 1e-06, %v192_v26 }
  0x9e   :  { %v332_v48 = vsel %vm331_vm7, %v1049_v1, %v328_v41  ;;  %v317_v2 = vsub.f32 1.5, %v316_v0  ;;  %vm319_vm9 = vweird.f32 %v1029_v16  ;;  %vm309_vm10 = vweird.f32 %v1057_v50 }
  0x9f   :  { %v571_v32 = vmul.f32 %v332_v48, %v810_v18  ;;  %v1138_v52 = vpop.eup %689  ;;  %v306_v57 = vmul.f32 0.5, %v305_v49  ;;  %v1148_v5 = vadd.f32 1e-06, %v191_v44  ;;  %vm321_vm11 = vmor %vm319_vm9, %vm320_vm8  ;;  %vm310_vm12 = vweird.f32 %v688_v8 }
  0xa0   :  { %v1142_v1 = vpop.eup %691  ;;  %v318_v62 = vmul.f32 %v1092_v22, %v317_v2  ;;  %v354_v18 = vmul.f32 %v1138_v52, %v1089_v31  ;;  %v129_v14 = vpop.xlane.xlu2 %128  ;;  %695 = vrsqrt.f32 %v1134_v51  ;;  %vm359_vm13 = vweird.f32 %v1089_v31  ;;  %vm311_vm15 = vmor %vm309_vm10, %vm310_vm12 }
  0xa1   :  { %v607_v61 = vmul.f32 %v1021_v9, %v571_v32  ;;  %v126_v15 = vpop.xlane.xlu1 %125  ;;  %v307_v16 = vsub.f32 1.5, %v306_v57  ;;  %v344_v24 = vmul.f32 %v1142_v1, %v1096_v33  ;;  %v123_v17 = vpop.xlane.xlu0 %122  ;;  %697 = vrsqrt.f32 %v1136_v58 }
  0xa2   :  { %v322_v21 = vsel %vm321_vm11, %v1092_v22, %v318_v62  ;;  %v355_v53 = vmul.f32 %v1138_v52, %v354_v18  ;;  %vm349_vm14 = vweird.f32 %v1096_v33  ;;  %vm360_vm1 = vweird.f32 %v1138_v52 }
  0xa3   :  { %639 = vst.msk [vmem:[%s1607_s2 + $0x40] sm:$0xff] %vm75_vm0, %v607_v61  ;;  %v1163_v25 = vpop.eup %693  ;;  %v570_v10 = vmul.f32 %v322_v21, %v815_v19  ;;  %v308_v30 = vmul.f32 %v688_v8, %v307_v16  ;;  %v345_v34 = vmul.f32 %v1142_v1, %v344_v24  ;;  %vm339_vm2 = vweird.f32 %v1119_v43  ;;  %vm361_vm6 = vmor %vm359_vm13, %vm360_vm1 }
  0xa4   :  { %v356_v6 = vmul.f32 0.5, %v355_v53  ;;  %v334_v22 = vmul.f32 %v1163_v25, %v1119_v43  ;;  %699 = vrsqrt.f32 %v1148_v5  ;;  %vm350_vm3 = vweird.f32 %v1142_v1 }
  0xa5   :  { %v606_v19 = vmul.f32 %v1021_v9, %v570_v10  ;;  %v312_v60 = vsel %vm311_vm15, %v688_v8, %v308_v30  ;;  %v346_v23 = vmul.f32 0.5, %v345_v34  ;;  %v196_v39 = vmul.f32 %v983_v59, %v129_v14  ;;  %vm351_vm9 = vmor %vm349_vm14, %vm350_vm3 }
  0xa6   :  { %v569_v12 = vmul.f32 %v312_v60, %v820_v20  ;;  %v357_v50 = vsub.f32 1.5, %v356_v6  ;;  %v335_v35 = vmul.f32 %v1163_v25, %v334_v22  ;;  %v1180_v7 = vpop.eup %695  ;;  %vm340_vm4 = vweird.f32 %v1163_v25 }
  0xa7   :  { %638 = vst.msk [vmem:[%s1607_s2 + $0x38] sm:$0xff] %vm75_vm0, %v606_v19  ;;  %v347_v11 = vsub.f32 1.5, %v346_v23  ;;  %vm389_vm5 = vweird.f32 %v1134_v51  ;;  %v195_v8 = vmul.f32 %v983_v59, %v126_v15  ;;  %v1189_v20 = vpop.eup %697  ;;  %v384_v0 = vmul.f32 %v1180_v7, %v1134_v51  ;;  %vm341_vm11 = vmor %vm339_vm2, %vm340_vm4 }
  0xa8   :  { %v605_v40 = vmul.f32 %v1021_v9, %v569_v12  ;;  %v358_v41 = vmul.f32 %v1138_v52, %v357_v50  ;;  %v336_v42 = vmul.f32 0.5, %v335_v35  ;;  %vm390_vm7 = vweird.f32 %v1180_v7  ;;  %v138_v57 = vpop.xlane.xlu2 %137 }
  0xa9   :  { %v348_v13 = vmul.f32 %v1142_v1, %v347_v11  ;;  %v374_v26 = vmul.f32 %v1189_v20, %v1136_v58  ;;  %vm379_vm8 = vweird.f32 %v1136_v58  ;;  %v194_v44 = vmul.f32 %v983_v59, %v123_v17  ;;  %v135_v61 = vpop.xlane.xlu1 %134  ;;  %v132_v15 = vpop.xlane.xlu0 %131  ;;  %vm391_vm13 = vmor %vm389_vm5, %vm390_vm7 }
  0xaa   :  { %v1205_v48 = vpop.eup %699  ;;  %637 = vst.msk [vmem:[%s1607_s2 + $0x30] sm:$0xff] %vm75_vm0, %v605_v40  ;;  %v362_v31 = vsel %vm361_vm6, %v1138_v52, %v358_v41  ;;  %v337_v49 = vsub.f32 1.5, %v336_v42  ;;  %v385_v32 = vmul.f32 %v1180_v7, %v384_v0  ;;  %v1217_v2 = vadd.f32 1e-06, %v196_v39 }
  0xab   :  { %v574_v62 = vmul.f32 %v362_v31, %v834_v27  ;;  %v352_v18 = vsel %vm351_vm9, %v1142_v1, %v348_v13  ;;  %v375_v14 = vmul.f32 %v1189_v20, %v374_v26  ;;  %v364_v52 = vmul.f32 %v1205_v48, %v1148_v5 }
  0xac   :  { %v573_v33 = vmul.f32 %v352_v18, %v839_v28  ;;  %v338_v16 = vmul.f32 %v1163_v25, %v337_v49  ;;  %v386_v24 = vmul.f32 0.5, %v385_v32  ;;  %vm380_vm10 = vweird.f32 %v1189_v20 }
  0xad   :  { %v610_v17 = vmul.f32 %v1021_v9, %v574_v62  ;;  %v376_v27 = vmul.f32 0.5, %v375_v14  ;;  %v365_v1 = vmul.f32 %v1205_v48, %v364_v52  ;;  %701 = vrsqrt.f32 %v1217_v2  ;;  %vm381_vm14 = vmor %vm379_vm8, %vm380_vm10 }
  0xae   :  { %v609_v21 = vmul.f32 %v1021_v9, %v573_v33  ;;  %v342_v28 = vsel %vm341_vm11, %v1163_v25, %v338_v16  ;;  %v387_v53 = vsub.f32 1.5, %v386_v24  ;;  %vm370_vm12 = vweird.f32 %v1205_v48 }
  0xaf   :  { %642 = vst.msk [vmem:[%s1607_s2 + $0x58] sm:$0xff] %vm75_vm0, %v610_v17  ;;  %v572_v43 = vmul.f32 %v342_v28, %v844_v29  ;;  %v377_v10 = vsub.f32 1.5, %v376_v27  ;;  %v366_v30 = vmul.f32 0.5, %v365_v1  ;;  %v1242_v34 = vadd.f32 1e-06, %v195_v8 }
  0xb0   :  { %641 = vst.msk [vmem:[%s1607_s2 + $0x50] sm:$0xff] %vm75_vm0, %v609_v21  ;;  %v388_v25 = vmul.f32 %v1180_v7, %v387_v53  ;;  %v1249_v6 = vadd.f32 1e-06, %v194_v44  ;;  %v199_v22 = vmul.f32 %v983_v59, %v138_v57  ;;  %v198_v19 = vmul.f32 %v983_v59, %v135_v61  ;;  %v147_v8 = vpop.xlane.xlu2 %146 }
  0xb1   :  { %v608_v60 = vmul.f32 %v1021_v9, %v572_v43  ;;  %v378_v29 = vmul.f32 %v1189_v20, %v377_v10  ;;  %v367_v23 = vsub.f32 1.5, %v366_v30  ;;  %703 = vrsqrt.f32 %v1242_v34  ;;  %v144_v40 = vpop.xlane.xlu1 %143 }
  0xb2   :  { %v392_v12 = vsel %vm391_vm13, %v1180_v7, %v388_v25  ;;  %vm369_vm15 = vweird.f32 %v1148_v5  ;;  %705 = vrsqrt.f32 %v1249_v6  ;;  %v1274_v7 = vadd.f32 1e-06, %v199_v22 }
  0xb3   :  { %v702_v50 = vpop.eup %701  ;;  %640 = vst.msk [vmem:[%s1607_s2 + $0x48] sm:$0xff] %vm75_vm0, %v608_v60  ;;  %v577_v51 = vmul.f32 %v392_v12, %v858_v36  ;;  %v382_v35 = vsel %vm381_vm14, %v1189_v20, %v378_v29  ;;  %v368_v39 = vmul.f32 %v1205_v48, %v367_v23  ;;  %vm371_vm1 = vmor %vm369_vm15, %vm370_vm12  ;;  %v1280_v11 = vadd.f32 1e-06, %v198_v19  ;;  %v141_v20 = vpop.xlane.xlu0 %140 }
  0xb4   :  { %v576_v58 = vmul.f32 %v382_v35, %v863_v37  ;;  %v414_v5 = vmul.f32 %v702_v50, %v1217_v2  ;;  %707 = vrsqrt.f32 %v1274_v7  ;;  %v197_v26 = vmul.f32 %v983_v59, %v132_v15 }
  0xb5   :  { %v613_v41 = vmul.f32 %v1021_v9, %v577_v51  ;;  %v372_v36 = vsel %vm371_vm1, %v1205_v48, %v368_v39  ;;  %709 = vrsqrt.f32 %v1280_v11  ;;  %v202_v44 = vmul.f32 %v983_v59, %v147_v8 }
  0xb6   :  { %v612_v42 = vmul.f32 %v1021_v9, %v576_v58  ;;  %v575_v37 = vmul.f32 %v372_v36, %v868_v38  ;;  %v415_v0 = vmul.f32 %v702_v50, %v414_v5  ;;  %v201_v48 = vmul.f32 %v983_v59, %v144_v40 }
  0xb7   :  { %v1288_v13 = vpop.eup %703  ;;  %645 = vst.msk [vmem:[%s1607_s2 + $0x70] sm:$0xff] %vm75_vm0, %v613_v41  ;;  %vm419_vm2 = vweird.f32 %v1217_v2  ;;  %vm409_vm3 = vweird.f32 %v1242_v34  ;;  %v1310_v61 = vadd.f32 1e-06, %v197_v26  ;;  %v1312_v62 = vadd.f32 1e-06, %v202_v44 }
  0xb8   :  { %v1297_v31 = vpop.eup %705  ;;  %644 = vst.msk [vmem:[%s1607_s2 + $0x68] sm:$0xff] %vm75_vm0, %v612_v42  ;;  %v611_v38 = vmul.f32 %v1021_v9, %v575_v37  ;;  %v416_v49 = vmul.f32 0.5, %v415_v0  ;;  %v404_v32 = vmul.f32 %v1288_v13, %v1242_v34  ;;  %vm420_vm4 = vweird.f32 %v702_v50  ;;  %v156_v19 = vpop.xlane.xlu2 %155 }
  0xb9   :  { %v394_v57 = vmul.f32 %v1297_v31, %v1249_v6  ;;  %v1319_v52 = vadd.f32 1e-06, %v201_v48  ;;  %vm399_vm5 = vweird.f32 %v1249_v6  ;;  %vm449_vm6 = vweird.f32 %v1274_v7  ;;  %vm421_vm7 = vmor %vm419_vm2, %vm420_vm4  ;;  %v153_v30 = vpop.xlane.xlu1 %152 }
  0xba   :  { %643 = vst.msk [vmem:[%s1607_s2 + $0x60] sm:$0xff] %vm75_vm0, %v611_v38  ;;  %v417_v18 = vsub.f32 1.5, %v416_v49  ;;  %v405_v14 = vmul.f32 %v1288_v13, %v404_v32  ;;  %v1321_v15 = vpop.eup %707  ;;  %711 = vrsqrt.f32 %v1310_v61  ;;  %v200_v1 = vmul.f32 %v983_v59, %v141_v20 }
  0xbb   :  { %v395_v33 = vmul.f32 %v1297_v31, %v394_v57  ;;  %v1327_v16 = vpop.eup %709  ;;  %v444_v27 = vmul.f32 %v1321_v15, %v1274_v7  ;;  %vm410_vm8 = vweird.f32 %v1288_v13  ;;  %vm439_vm9 = vweird.f32 %v1280_v11  ;;  %v1344_v60 = vpop.xlane.xlu0 %149 }
  0xbc   :  { %v418_v24 = vmul.f32 %v702_v50, %v417_v18  ;;  %v406_v17 = vmul.f32 0.5, %v405_v14  ;;  %v434_v28 = vmul.f32 %v1327_v16, %v1280_v11  ;;  %713 = vrsqrt.f32 %v1312_v62  ;;  %vm411_vm12 = vmor %vm409_vm3, %vm410_vm8 }
  0xbd   :  { %v396_v21 = vmul.f32 0.5, %v395_v33  ;;  %v445_v10 = vmul.f32 %v1321_v15, %v444_v27  ;;  %715 = vrsqrt.f32 %v1319_v52  ;;  %vm400_vm10 = vweird.f32 %v1297_v31 }
  0xbe   :  { %v422_v53 = vsel %vm421_vm7, %v702_v50, %v418_v24  ;;  %v407_v43 = vsub.f32 1.5, %v406_v17  ;;  %v435_v22 = vmul.f32 %v1327_v16, %v434_v28  ;;  %vm450_vm11 = vweird.f32 %v1321_v15  ;;  %vm401_vm14 = vmor %vm399_vm5, %vm400_vm10 }
  0xbf   :  { %v580_v2 = vmul.f32 %v422_v53, %v882_v45  ;;  %v397_v25 = vsub.f32 1.5, %v396_v21  ;;  %v446_v23 = vmul.f32 0.5, %v445_v10  ;;  %v1348_v12 = vadd.f32 1e-06, %v200_v1  ;;  %vm451_vm2 = vmor %vm449_vm6, %vm450_vm11 }
  0xc0   :  { %v408_v29 = vmul.f32 %v1288_v13, %v407_v43  ;;  %v1350_v50 = vpop.eup %711  ;;  %v436_v35 = vmul.f32 0.5, %v435_v22  ;;  %vm440_vm13 = vweird.f32 %v1327_v16  ;;  %vm429_vm15 = vweird.f32 %v1310_v61  ;;  %v165_v53 = vpop.xlane.xlu2 %164 }
  0xc1   :  { %v616_v51 = vmul.f32 %v1021_v9, %v580_v2  ;;  %v398_v45 = vmul.f32 %v1297_v31, %v397_v25  ;;  %v447_v58 = vsub.f32 1.5, %v446_v23  ;;  %v424_v5 = vmul.f32 %v1350_v50, %v1310_v61  ;;  %vm441_vm3 = vmor %vm439_vm9, %vm440_vm13  ;;  %v162_v14 = vpop.xlane.xlu1 %161 }
  0xc2   :  { %v412_v39 = vsel %vm411_vm12, %v1288_v13, %v408_v29  ;;  %vm479_vm1 = vweird.f32 %v1312_v62  ;;  %v205_v34 = vmul.f32 %v983_v59, %v156_v19  ;;  %v1369_v8 = vpop.eup %713  ;;  %v437_v41 = vsub.f32 1.5, %v436_v35 }
  0xc3   :  { %648 = vst.msk [vmem:[%s1607_s2 + $0x88] sm:$0xff] %vm75_vm0, %v616_v51  ;;  %v579_v6 = vmul.f32 %v412_v39, %v887_v46  ;;  %v402_v40 = vsel %vm401_vm14, %v1297_v31, %v398_v45  ;;  %717 = vrsqrt.f32 %v1348_v12  ;;  %v1378_v36 = vpop.eup %715  ;;  %v448_v42 = vmul.f32 %v1321_v15, %v447_v58  ;;  %v159_v17 = vpop.xlane.xlu0 %158 }
  0xc4   :  { %v578_v20 = vmul.f32 %v402_v40, %v892_v47  ;;  %v425_v37 = vmul.f32 %v1350_v50, %v424_v5  ;;  %v474_v0 = vmul.f32 %v1369_v8, %v1312_v62  ;;  %v438_v46 = vmul.f32 %v1327_v16, %v437_v41 }
  0xc5   :  { %v615_v13 = vmul.f32 %v1021_v9, %v579_v6  ;;  %v464_v26 = vmul.f32 %v1378_v36, %v1319_v52  ;;  %v204_v47 = vmul.f32 %v983_v59, %v153_v30  ;;  %v452_v48 = vsel %vm451_vm2, %v1321_v15, %v448_v42 }
  0xc6   :  { %v614_v44 = vmul.f32 %v1021_v9, %v578_v20  ;;  %v426_v31 = vmul.f32 0.5, %v425_v37  ;;  %v475_v7 = vmul.f32 %v1369_v8, %v474_v0  ;;  %v583_v38 = vmul.f32 %v452_v48, %v906_v54 }
  0xc7   :  { %647 = vst.msk [vmem:[%s1607_s2 + $0x80] sm:$0xff] %vm75_vm0, %v615_v13  ;;  %v442_v49 = vsel %vm441_vm3, %v1327_v16, %v438_v46  ;;  %vm430_vm4 = vweird.f32 %v1350_v50  ;;  %v465_v32 = vmul.f32 %v1378_v36, %v464_v26  ;;  %vm480_vm5 = vweird.f32 %v1369_v8 }
  0xc8   :  { %646 = vst.msk [vmem:[%s1607_s2 + $0x78] sm:$0xff] %vm75_vm0, %v614_v44  ;;  %v582_v11 = vmul.f32 %v442_v49, %v911_v55  ;;  %v427_v57 = vsub.f32 1.5, %v426_v31  ;;  %v476_v18 = vmul.f32 0.5, %v475_v7  ;;  %v619_v54 = vmul.f32 %v1021_v9, %v583_v38  ;;  %vm431_vm6 = vmor %vm429_vm15, %vm430_vm4 }
  0xc9   :  { %v718_v15 = vpop.eup %717  ;;  %v466_v33 = vmul.f32 0.5, %v465_v32  ;;  %v1416_v16 = vadd.f32 1e-06, %v205_v34  ;;  %v1418_v24 = vadd.f32 1e-06, %v204_v47  ;;  %vm469_vm7 = vweird.f32 %v1319_v52  ;;  %vm481_vm9 = vmor %vm479_vm1, %vm480_vm5  ;;  %v171_v6 = vpop.xlane.xlu1 %170 }
  0xca   :  { %v618_v27 = vmul.f32 %v1021_v9, %v582_v11  ;;  %v428_v1 = vmul.f32 %v1350_v50, %v427_v57  ;;  %v477_v21 = vsub.f32 1.5, %v476_v18  ;;  %v454_v55 = vmul.f32 %v718_v15, %v1348_v12  ;;  %651 = vst.msk [vmem:[%s1607_s2 + $0xa0] sm:$0xff] %vm75_vm0, %v619_v54 }
  0xcb   :  { %v467_v28 = vsub.f32 1.5, %v466_v33  ;;  %vm470_vm8 = vweird.f32 %v1378_v36  ;;  %719 = vrsqrt.f32 %v1416_v16  ;;  %vm460_vm10 = vweird.f32 %v718_v15  ;;  %v168_v41 = vpop.xlane.xlu0 %167 }
  0xcc   :  { %650 = vst.msk [vmem:[%s1607_s2 + $0x98] sm:$0xff] %vm75_vm0, %v618_v27  ;;  %v432_v43 = vsel %vm431_vm6, %v1350_v50, %v428_v1  ;;  %v478_v10 = vmul.f32 %v1369_v8, %v477_v21  ;;  %v455_v30 = vmul.f32 %v718_v15, %v454_v55  ;;  %721 = vrsqrt.f32 %v1418_v24  ;;  %vm471_vm11 = vmor %vm469_vm7, %vm470_vm8  ;;  %v736_v21 = vld [vmem:[%s1605_s0 + $0xc8] sm:$0xff] }
  0xcd   :  { %v581_v61 = vmul.f32 %v432_v43, %v916_v56  ;;  %v468_v2 = vmul.f32 %v1378_v36, %v467_v28  ;;  %v203_v25 = vmul.f32 %v983_v59, %v1344_v60  ;;  %v208_v29 = vmul.f32 %v983_v59, %v165_v53 }
  0xce   :  { %v482_v22 = vsel %vm481_vm9, %v1369_v8, %v478_v10  ;;  %v456_v19 = vmul.f32 0.5, %v455_v30  ;;  %v207_v56 = vmul.f32 %v983_v59, %v162_v14  ;;  %vm459_vm12 = vweird.f32 %v1348_v12 }
  0xcf   :  { %v617_v23 = vmul.f32 %v1021_v9, %v581_v61  ;;  %v586_v62 = vmul.f32 %v482_v22, %v930_v63  ;;  %v472_v50 = vsel %vm471_vm11, %v1378_v36, %v468_v2  ;;  %v1457_v51 = vadd.f32 1e-06, %v203_v25  ;;  %vm461_vm13 = vmor %vm459_vm12, %vm460_vm10 }
  0xd0   :  { %v585_v60 = vmul.f32 %v472_v50, %v935_v3  ;;  %v457_v45 = vsub.f32 1.5, %v456_v19  ;;  %v1460_v35 = vadd.f32 1e-06, %v208_v29  ;;  %v1462_v52 = vadd.f32 1e-06, %v207_v56 }
  0xd1   :  { %v720_v39 = vpop.eup %719  ;;  %649 = vst.msk [vmem:[%s1607_s2 + $0x90] sm:$0xff] %vm75_vm0, %v617_v23  ;;  %v622_v58 = vmul.f32 %v1021_v9, %v586_v62  ;;  %723 = vrsqrt.f32 %v1457_v51  ;;  %v206_v63 = vmul.f32 %v983_v59, %v159_v17  ;;  %v210_v0 = vmul.f32 %v983_v59, %v171_v6 }
  0xd2   :  { %v722_v5 = vpop.eup %721  ;;  %v621_v3 = vmul.f32 %v1021_v9, %v585_v60  ;;  %v458_v34 = vmul.f32 %v718_v15, %v457_v45  ;;  %v504_v8 = vmul.f32 %v720_v39, %v1416_v16  ;;  %725 = vrsqrt.f32 %v1460_v35 }
  0xd3   :  { %654 = vst.msk [vmem:[%s1607_s2 + $0xb8] sm:$0xff] %vm75_vm0, %v622_v58  ;;  %v494_v40 = vmul.f32 %v722_v5, %v1418_v24  ;;  %727 = vrsqrt.f32 %v1462_v52  ;;  %v1487_v37 = vadd.f32 1e-06, %v206_v63  ;;  %v209_v46 = vmul.f32 %v983_v59, %v168_v41 }
  0xd4   :  { %653 = vst.msk [vmem:[%s1607_s2 + $0xb0] sm:$0xff] %vm75_vm0, %v621_v3  ;;  %v462_v12 = vsel %vm461_vm13, %v718_v15, %v458_v34  ;;  %v505_v36 = vmul.f32 %v720_v39, %v504_v8  ;;  %vm509_vm14 = vweird.f32 %v1416_v16  ;;  %vm510_vm15 = vweird.f32 %v720_v39  ;;  %v735_v16 = vld [vmem:[%s1605_s0 + $0xd0] sm:$0xff]  ;;  %v738_v8 = vld [vmem:[%s1605_s0 + $0xe8] sm:$0xff] }
  0xd5   :  { %v584_v20 = vmul.f32 %v462_v12, %v940_v4  ;;  %v495_v42 = vmul.f32 %v722_v5, %v494_v40  ;;  %729 = vrsqrt.f32 %v1487_v37  ;;  %v1495_v31 = vadd.f32 1e-06, %v210_v0  ;;  %vm511_vm3 = vmor %vm509_vm14, %vm510_vm15 }
  0xd6   :  { %v506_v13 = vmul.f32 0.5, %v505_v36  ;;  %vm500_vm1 = vweird.f32 %v722_v5  ;;  %v1503_v38 = vadd.f32 1e-06, %v209_v46  ;;  %vm499_vm2 = vweird.f32 %v1418_v24  ;;  %v740_v46 = vld [vmem:[%s1605_s0 + $0xd8] sm:$0xff] }
  0xd7   :  { %v724_v26 = vpop.eup %723  ;;  %v620_v47 = vmul.f32 %v1021_v9, %v584_v20  ;;  %v496_v44 = vmul.f32 0.5, %v495_v42  ;;  %vm489_vm4 = vweird.f32 %v1457_v51  ;;  %731 = vrsqrt.f32 %v1495_v31  ;;  %vm501_vm5 = vmor %vm499_vm2, %vm500_vm1 }
  0xd8   :  { %v507_v48 = vsub.f32 1.5, %v506_v13  ;;  %v484_v4 = vmul.f32 %v724_v26, %v1457_v51  ;;  %v1497_v7 = vpop.eup %725  ;;  %vm490_vm6 = vweird.f32 %v724_v26  ;;  %733 = vrsqrt.f32 %v1503_v38  ;;  %v737_v51 = vld [vmem:[%s1605_s0 + $0xc0] sm:$0xff] }
  0xd9   :  { %652 = vst.msk [vmem:[%s1607_s2 + $0xa8] sm:$0xff] %vm75_vm0, %v620_v47  ;;  %v497_v59 = vsub.f32 1.5, %v496_v44  ;;  %v1505_v49 = vpop.eup %727  ;;  %v534_v57 = vmul.f32 %v1497_v7, %v1460_v35  ;;  %vm539_vm7 = vweird.f32 %v1460_v35  ;;  %vm540_vm8 = vweird.f32 %v1497_v7  ;;  %vm491_vm9 = vmor %vm489_vm4, %vm490_vm6 }
  0xda   :  { %v508_v32 = vmul.f32 %v720_v39, %v507_v48  ;;  %v485_v11 = vmul.f32 %v724_v26, %v484_v4  ;;  %v524_v14 = vmul.f32 %v1505_v49, %v1462_v52  ;;  %vm530_vm10 = vweird.f32 %v1505_v49  ;;  %vm541_vm11 = vmor %vm539_vm7, %vm540_vm8 }
  0xdb   :  { %v498_v18 = vmul.f32 %v722_v5, %v497_v59  ;;  %v535_v33 = vmul.f32 %v1497_v7, %v534_v57  ;;  %v730_v24 = vpop.eup %729  ;;  %vm529_vm12 = vweird.f32 %v1462_v52  ;;  %vm519_vm15 = vweird.f32 %v1487_v37  ;;  %v739_v52 = vld [vmem:[%s1605_s0 + $0xe0] sm:$0xff]  ;;  %v741_v59 = vld [vmem:[%s1605_s0 + $0xf8] sm:$0xff] }
  0xdc   :  { %v512_v15 = vsel %vm511_vm3, %v720_v39, %v508_v32  ;;  %v486_v54 = vmul.f32 0.5, %v485_v11  ;;  %v525_v1 = vmul.f32 %v1505_v49, %v524_v14  ;;  %v514_v43 = vmul.f32 %v730_v24, %v1487_v37  ;;  %vm531_vm14 = vmor %vm529_vm12, %vm530_vm10  ;;  %v742_v11 = vld [vmem:[%s1605_s0 + $0xf0] sm:$0xff] }
  0xdd   :  { %v589_v17 = vmul.f32 %v735_v16, %v512_v15  ;;  %v502_v27 = vsel %vm501_vm5, %v722_v5, %v498_v18  ;;  %v536_v53 = vmul.f32 0.5, %v535_v33  ;;  %v732_v19 = vpop.eup %731  ;;  %vm520_vm13 = vweird.f32 %v730_v24 }
  0xde   :  { %v588_v55 = vmul.f32 %v736_v21, %v502_v27  ;;  %v487_v28 = vsub.f32 1.5, %v486_v54  ;;  %v526_v30 = vmul.f32 0.5, %v525_v1  ;;  %v515_v22 = vmul.f32 %v730_v24, %v514_v43  ;;  %v734_v60 = vpop.eup %733  ;;  %vm521_vm1 = vmor %vm519_vm15, %vm520_vm13 }
  0xdf   :  { %v625_v10 = vmul.f32 %v1021_v9, %v589_v17  ;;  %v537_v25 = vsub.f32 1.5, %v536_v53  ;;  %v554_v50 = vmul.f32 %v732_v19, %v1495_v31  ;;  %v544_v3 = vmul.f32 %v734_v60, %v1503_v38 }
  0xe0   :  { %v624_v61 = vmul.f32 %v1021_v9, %v588_v55  ;;  %v488_v2 = vmul.f32 %v724_v26, %v487_v28  ;;  %v527_v29 = vsub.f32 1.5, %v526_v30  ;;  %v516_v62 = vmul.f32 0.5, %v515_v22 }
  0xe1   :  { %657 = vst.msk [vmem:[%s1607_s2 + $0xd0] sm:$0xff] %vm75_vm0, %v625_v10  ;;  %v538_v23 = vmul.f32 %v1497_v7, %v537_v25  ;;  %v555_v5 = vmul.f32 %v732_v19, %v554_v50  ;;  %v545_v36 = vmul.f32 %v734_v60, %v544_v3  ;;  %vm560_vm2 = vweird.f32 %v732_v19 }
  0xe2   :  { %656 = vst.msk [vmem:[%s1607_s2 + $0xc8] sm:$0xff] %vm75_vm0, %v624_v61  ;;  %v492_v56 = vsel %vm491_vm9, %v724_v26, %v488_v2  ;;  %v528_v39 = vmul.f32 %v1505_v49, %v527_v29  ;;  %v517_v63 = vsub.f32 1.5, %v516_v62  ;;  %vm559_vm3 = vweird.f32 %v1495_v31 }
  0xe3   :  { %v587_v45 = vmul.f32 %v737_v51, %v492_v56  ;;  %v542_v58 = vsel %vm541_vm11, %v1497_v7, %v538_v23  ;;  %v556_v12 = vmul.f32 0.5, %v555_v5  ;;  %v546_v13 = vmul.f32 0.5, %v545_v36  ;;  %vm561_vm5 = vmor %vm559_vm3, %vm560_vm2 }
  0xe4   :  { %v592_v35 = vmul.f32 %v738_v8, %v542_v58  ;;  %v532_v6 = vsel %vm531_vm14, %v1505_v49, %v528_v39  ;;  %v518_v41 = vmul.f32 %v730_v24, %v517_v63  ;;  %vm550_vm4 = vweird.f32 %v734_v60 }
  0xe5   :  { %v623_v34 = vmul.f32 %v1021_v9, %v587_v45  ;;  %v591_v40 = vmul.f32 %v739_v52, %v532_v6  ;;  %v557_v0 = vsub.f32 1.5, %v556_v12  ;;  %v547_v44 = vsub.f32 1.5, %v546_v13 }
  0xe6   :  { %v628_v20 = vmul.f32 %v1021_v9, %v592_v35  ;;  %v522_v37 = vsel %vm521_vm1, %v730_v24, %v518_v41  ;;  %vm549_vm6 = vweird.f32 %v1503_v38 }
  0xe7   :  { %655 = vst.msk [vmem:[%s1607_s2 + $0xc0] sm:$0xff] %vm75_vm0, %v623_v34  ;;  %v627_v42 = vmul.f32 %v1021_v9, %v591_v40  ;;  %v590_v26 = vmul.f32 %v740_v46, %v522_v37  ;;  %v558_v47 = vmul.f32 %v732_v19, %v557_v0  ;;  %v548_v7 = vmul.f32 %v734_v60, %v547_v44  ;;  %vm551_vm7 = vmor %vm549_vm6, %vm550_vm4 }
  0xe8   :  { %660 = vst.msk [vmem:[%s1607_s2 + $0xe8] sm:$0xff] %vm75_vm0, %v628_v20 }
  0xe9   :  { %659 = vst.msk [vmem:[%s1607_s2 + $0xe0] sm:$0xff] %vm75_vm0, %v627_v42  ;;  %v626_v48 = vmul.f32 %v1021_v9, %v590_v26  ;;  %v562_v4 = vsel %vm561_vm5, %v732_v19, %v558_v47  ;;  %v552_v31 = vsel %vm551_vm7, %v734_v60, %v548_v7 }
  0xea   :  { %v594_v49 = vmul.f32 %v741_v59, %v562_v4  ;;  %v593_v57 = vmul.f32 %v742_v11, %v552_v31 }
  0xeb   :  { %658 = vst.msk [vmem:[%s1607_s2 + $0xd8] sm:$0xff] %vm75_vm0, %v626_v48 }
  0xec   :  { %v630_v32 = vmul.f32 %v1021_v9, %v594_v49  ;;  %v629_v38 = vmul.f32 %v1021_v9, %v593_v57 }
  0xee   :  { %662 = vst.msk [vmem:[%s1607_s2 + $0xf8] sm:$0xff] %vm75_vm0, %v630_v32 }
  0xef   :  { %661 = vst.msk [vmem:[%s1607_s2 + $0xf0] sm:$0xff] %vm75_vm0, %v629_v38 }

</bundles_post_ra>
